<compile_context>
chip_gen: v7x
topology: tpu7x:2x2x1
jax: 0.10.0
libtpu: 0.0.40
codegen_flags: <defaults>
</compile_context>

<pallas_src>
import jax
import jax.numpy as jnp
from jax import lax
from jax.experimental import pallas as pl
from jax.experimental.pallas import tpu as pltpu

_MIB = 1024 * 1024


def _round_up(x, m):
    return ((x + m - 1) // m) * m


def _pad_nodes(n):
    """Padded node count: one <=512 tile for small graphs, multiples of 512 otherwise."""
    return _round_up(n, 128) if n <= 512 else _round_up(n, 512)


def _vmem_budget_bytes():
    """Usable VMEM budget: physical capacity minus 16 MiB compiler headroom.
    v7x -> ~48 MiB, v5e/v6e -> ~112 MiB; conservative 48 MiB if query fails."""
    cap = 64 * _MIB
    try:
        info = pltpu.get_tpu_info()
        cap = int(getattr(info, "vmem_capacity_bytes", cap))
    except Exception:
        pass
    return max(32 * _MIB, cap - 16 * _MIB)


# ---------------------------------------------------------------------------
# Kernel 1a: fused K-hop propagation, S resident in VMEM (small/medium graphs)
# ---------------------------------------------------------------------------
def _make_fused_propagate_kernel(K):
    def kernel(s_ref, x_ref, o_ref, buf_a, buf_b):
        # S stays in VMEM for all K hops; intermediates ping-pong between two
        # bf16 VMEM scratch buffers.  K is a static Python int -> unrolled.
        # TODO(synk): single grid step -> one TensorCore on v7x; acceptable for the
        #             small graphs this path covers (HBM-traffic saving dominates).
        bufs = (buf_a, buf_b)
        for hop in range(K):
            src = x_ref if hop == 0 else bufs[(hop - 1) % 2]
            y = jnp.dot(s_ref[...], src[...], preferred_element_type=jnp.float32)
            if hop == K - 1:
                o_ref[...] = y.astype(o_ref.dtype)
            else:
                bufs[hop % 2][...] = y.astype(jnp.bfloat16)
    return kernel


def _fused_propagate(S_bf16, x_bf16, K, out_dtype, vmem_bytes):
    Np, F_pad = x_bf16.shape
    return pl.pallas_call(
        _make_fused_propagate_kernel(K),
        out_shape=jax.ShapeDtypeStruct((Np, F_pad), out_dtype),
        grid_spec=pltpu.PrefetchScalarGridSpec(
            num_scalar_prefetch=0,
            grid=(1,),
            in_specs=[pl.BlockSpec((Np, Np), lambda i: (0, 0)),      # S, loaded once
                      pl.BlockSpec((Np, F_pad), lambda i: (0, 0))],  # features
            out_specs=pl.BlockSpec((Np, F_pad), lambda i: (0, 0)),
            scratch_shapes=[pltpu.VMEM((Np, F_pad), jnp.bfloat16),
                            pltpu.VMEM((Np, F_pad), jnp.bfloat16)]),
        compiler_params=pltpu.CompilerParams(
            dimension_semantics=("arbitrary",),
            vmem_limit_bytes=int(vmem_bytes)),
    )(S_bf16, x_bf16)


# ---------------------------------------------------------------------------
# Kernel 1b: one propagation hop  out = S @ x  (tiled fallback for large graphs)
# ---------------------------------------------------------------------------
def _spmm_hop_kernel(s_ref, x_ref, o_ref, acc_ref):
    k = pl.program_id(1)

    @pl.when(k == 0)
    def _():
        acc_ref[...] = jnp.zeros_like(acc_ref)

    # bf16 x bf16 on the MXU, f32 accumulation only.
    acc_ref[...] += jnp.dot(s_ref[...], x_ref[...],
                            preferred_element_type=jnp.float32)

    @pl.when(k == pl.num_programs(1) - 1)
    def _():
        o_ref[...] = acc_ref[...].astype(o_ref.dtype)


def _hop_tile_bytes(tm, tk, F_pad, out_bytes):
    return (2 * tm * tk * 2               # S tiles (bf16, double-buffered)
            + 2 * tk * F_pad * 2          # feature tiles (bf16, double-buffered)
            + 2 * tm * F_pad * out_bytes  # output tiles (double-buffered)
            + tm * F_pad * 4)             # f32 accumulator scratch


def _pick_hop_tiles(Np, F_pad, out_bytes, budget):
    """Largest contraction tile (then row tile) whose footprint fits the budget."""
    if Np <= 512:
        return Np, Np
    cands = []
    for tk in (2048, 1024, 512):          # bigger tk when F_pad is small
        if Np % tk == 0:
            cands.append((512, tk))
    for tm in (256, 128):                 # shrink rows only if F_pad is huge
        cands.append((tm, 512))
    for tm, tk in cands:
        if _hop_tile_bytes(tm, tk, F_pad, out_bytes) * 3 // 2 <= budget:
            return tm, tk
    return cands[-1]


def _spmm_hop(S_bf16, x_bf16, out_dtype, tm, tk, vmem_bytes):
    Np, F_pad = x_bf16.shape
    grid = (Np // tm, Np // tk)
    return pl.pallas_call(
        _spmm_hop_kernel,
        out_shape=jax.ShapeDtypeStruct((Np, F_pad), out_dtype),
        grid_spec=pltpu.PrefetchScalarGridSpec(
            num_scalar_prefetch=0,
            grid=grid,
            in_specs=[pl.BlockSpec((tm, tk), lambda i, k: (i, k)),      # S tile
                      pl.BlockSpec((tk, F_pad), lambda i, k: (k, 0))],  # feature tile
            out_specs=pl.BlockSpec((tm, F_pad), lambda i, k: (i, 0)),   # resident over k
            scratch_shapes=[pltpu.VMEM((tm, F_pad), jnp.float32)]),
        compiler_params=pltpu.CompilerParams(
            dimension_semantics=("parallel", "arbitrary"),
            vmem_limit_bytes=int(vmem_bytes)),
    )(S_bf16, x_bf16)


def propagate(S_bf16, x_pad, K, out_dtype):
    """x <- S^K x.  Fused (S resident in VMEM) when it fits, tiled per-hop otherwise."""
    if K <= 0:
        return x_pad.astype(out_dtype)
    Np, F_pad = x_pad.shape
    out_bytes = jnp.dtype(out_dtype).itemsize
    budget = _vmem_budget_bytes()
    x_bf16 = x_pad.astype(jnp.bfloat16)

    # Fused-path footprint: S + x + 2 ping-pong buffers + out + f32 matmul temp.
    fused_est = (Np * Np * 2 + 3 * Np * F_pad * 2
                 + Np * F_pad * out_bytes + Np * F_pad * 4)
    if 2 * fused_est + 4 * _MIB <= budget:
        vmem = min(budget, max(8 * _MIB, 2 * fused_est + 4 * _MIB))
        return _fused_propagate(S_bf16, x_bf16, K, out_dtype, vmem)

    # Fallback: per-hop tiled matmul, S streamed from HBM each hop.
    tm, tk = _pick_hop_tiles(Np, F_pad, out_bytes, budget)
    cur = x_bf16
    for hop in range(K):
        hop_dtype = out_dtype if hop == K - 1 else jnp.bfloat16
        hb = jnp.dtype(hop_dtype).itemsize
        vmem = min(budget, max(8 * _MIB, 2 * _hop_tile_bytes(tm, tk, F_pad, hb)))
        cur = _spmm_hop(S_bf16, cur, hop_dtype, tm, tk, vmem)
    return cur


# ---------------------------------------------------------------------------
# Kernel 2: linear layer  y = x @ W^T + b  (row-tiled, lane-dense padded output)
# ---------------------------------------------------------------------------
def _linear_kernel(x_ref, wt_ref, b_ref, o_ref):
    # W was padded + transposed once in the wrapper -> natural (K, N) MXU layout.
    y = jnp.dot(x_ref[...], wt_ref[...], preferred_element_type=jnp.float32)
    o_ref[...] = (y + b_ref[...]).astype(o_ref.dtype)


def _lin_tile_bytes(tm, Fin_pad, Fout_pad):
    return 2 * tm * Fin_pad * 4 + Fin_pad * Fout_pad * 4 + 2 * tm * Fout_pad * 4


def linear(xc_pad, wt_pad, b_pad, tm, vmem_bytes):
    Nup, Fin_pad = xc_pad.shape
    Fout_pad = wt_pad.shape[1]
    return pl.pallas_call(
        _linear_kernel,
        out_shape=jax.ShapeDtypeStruct((Nup, Fout_pad), xc_pad.dtype),
        grid_spec=pltpu.PrefetchScalarGridSpec(
            num_scalar_prefetch=0,
            grid=(Nup // tm,),
            in_specs=[pl.BlockSpec((tm, Fin_pad), lambda i: (i, 0)),
                      pl.BlockSpec((Fin_pad, Fout_pad), lambda i: (0, 0)),
                      pl.BlockSpec((1, Fout_pad), lambda i: (0, 0))],
            out_specs=pl.BlockSpec((tm, Fout_pad), lambda i: (i, 0))),
        compiler_params=pltpu.CompilerParams(
            dimension_semantics=("parallel",),
            vmem_limit_bytes=int(vmem_bytes)),
    )(xc_pad, wt_pad, b_pad)


# ---------------------------------------------------------------------------
# Plain-JAX glue
# ---------------------------------------------------------------------------
def build_norm_adj_padded(edge_index, num_nodes, num_pad):
    """D^-1/2 (A + I) D^-1/2 built directly at the padded size, returned as bf16.
    Padded rows/cols have zero degree -> zero rows/cols -> no effect on the matmul."""
    src, dst = edge_index[0], edge_index[1]
    A = jnp.zeros((num_pad, num_pad), jnp.float32).at[dst, src].set(1.0)
    diag = jnp.arange(num_nodes)
    A = A.at[diag, diag].set(1.0)                      # add self loops
    deg = A.sum(axis=1)
    dinv = jnp.where(deg > 0, lax.rsqrt(deg), 0.0)
    return ((dinv[:, None] * A) * dinv[None, :]).astype(jnp.bfloat16)


def compress_cluster(x, param_H):
    """Dedup rows on param_H-quantized keys; return (representative rows, inverse index)."""
    keys = jnp.round(x * param_H)
    _, first_idx, inv = jnp.unique(keys, axis=0, size=x.shape[0], fill_value=0.0,
                                   return_index=True, return_inverse=True)
    centroids = x[first_idx]                           # representative original rows
    return centroids, inv.reshape(-1).astype(jnp.int32)


def reconstruct(y, index):
    return y[index]                                    # gather rows back to node order


def sgc_forward(x, edge_index, weight, bias, K, param_H=1):
    N, Fin = x.shape
    Fout = weight.shape[0]
    x_dtype = x.dtype

    # ---- lane-dense padding of nodes and features ----
    Np = _pad_nodes(N)
    F_pad = _round_up(Fin, 128)

    # ---- K-hop propagation (Pallas, bf16 operands, f32 accumulate) ----
    S = build_norm_adj_padded(edge_index, N, Np)       # (Np, Np) bf16
    xp = jnp.pad(x, ((0, Np - N), (0, F_pad - Fin)))   # (Np, F_pad)
    xprop = propagate(S, xp, K, x_dtype)[:N]           # (N, F_pad), x.dtype

    # ---- cluster (data-dependent row dedup; plain-JAX glue) ----
    xc, index = compress_cluster(xprop, param_H)       # (N, F_pad) kept at F_pad
    Nu = xc.shape[0]

    # ---- linear on clustered rows (Pallas; W padded+transposed once, lane-dense out) ----
    Fout_pad = _round_up(Fout, 128)
    wt_pad = jnp.pad(weight, ((0, Fout_pad - Fout), (0, F_pad - Fin))).T  # (F_pad, Fout_pad)
    b_pad = jnp.pad(bias, (0, Fout_pad - Fout)).reshape(1, Fout_pad)

    budget = _vmem_budget_bytes()
    tm = min(1024, _round_up(Nu, 8))
    while tm > 8 and 2 * _lin_tile_bytes(tm, F_pad, Fout_pad) > budget:
        tm = max(8, _round_up(tm // 2, 8))
    Nup = _round_up(Nu, tm)
    xcp = jnp.pad(xc, ((0, Nup - Nu), (0, 0)))
    vmem = min(budget, max(8 * _MIB, 2 * _lin_tile_bytes(tm, F_pad, Fout_pad)))
    y = linear(xcp, wt_pad, b_pad, tm, vmem)[:Nu, :Fout]

    # ---- reconstruct (glue gather) ----
    out = reconstruct(y, index)
    # log_softmax is computed-then-discarded in the reference forward; omitted.
    return out


# ---------------------------------------------------------------------------
if __name__ == "__main__":
    key = jax.random.PRNGKey(0)

    N = 16            # nodes
    in_features = 8
    out_features = 4
    K = 2
    param_H = 1

    k_x, k_w, k_b = jax.random.split(key, 3)
    x = jax.random.normal(k_x, (N, in_features), jnp.float32)

    # ring graph, both directions
    src = jnp.arange(N, dtype=jnp.int32)
    dst = (src + 1) % N
    edge_index = jnp.stack([jnp.concatenate([src, dst]),
                            jnp.concatenate([dst, src])], axis=0)   # (2, 2N)

    # torch.nn.Linear default init: U(-1/sqrt(fan_in), 1/sqrt(fan_in))
    bound = 1.0 / jnp.sqrt(jnp.float32(in_features))
    weight = jax.random.uniform(k_w, (out_features, in_features), jnp.float32,
                                -bound, bound)
    bias = jax.random.uniform(k_b, (out_features,), jnp.float32, -bound, bound)

    out = sgc_forward(x, edge_index, weight, bias, K, param_H)
    jax.block_until_ready(out)
    assert out.shape == (N, out_features)
    print("KERNEL_OK")
</pallas_src>

<mosaic_0001>
module attributes {stable_mosaic.version = 11 : i64} {
  func.func @kernel(%arg0: i32, %arg1: memref<128x128xbf16, #tpu.memory_space<vmem>>, %arg2: memref<128x128xbf16, #tpu.memory_space<vmem>>, %arg3: memref<128x128xf32, #tpu.memory_space<vmem>>, %arg4: memref<128x128xbf16, #tpu.memory_space<vmem>>, %arg5: memref<128x128xbf16, #tpu.memory_space<vmem>>) attributes {dimension_semantics = [#tpu.dimension_semantics<arbitrary>], iteration_bounds = array<i64: 1>, scalar_prefetch = 0 : i64, scratch_operands = 2 : i64, tpu.core_type = #tpu.core_type<tc>, window_params = [{pipeline_mode = #tpu.pipeline_mode<synchronous>, transform_indices = @transform_0, window_bounds = array<i64: 128, 128>}, {pipeline_mode = #tpu.pipeline_mode<synchronous>, transform_indices = @transform_1, window_bounds = array<i64: 128, 128>}, {pipeline_mode = #tpu.pipeline_mode<synchronous>, transform_indices = @transform_2, window_bounds = array<i64: 128, 128>}]} {
    %c0 = arith.constant 0 : index
    %c0_0 = arith.constant 0 : index
    %0 = vector.load %arg1[%c0, %c0_0] : memref<128x128xbf16, #tpu.memory_space<vmem>>, vector<128x128xbf16>
    %c0_1 = arith.constant 0 : index
    %c0_2 = arith.constant 0 : index
    %1 = vector.load %arg2[%c0_1, %c0_2] : memref<128x128xbf16, #tpu.memory_space<vmem>>, vector<128x128xbf16>
    %cst = arith.constant dense<0.000000e+00> : vector<128x128xf32>
    %2 = tpu.matmul %0, %1, %cst {dimension_numbers = #tpu.dot_dimension_numbers<[1], [0], [0], [1], [0, 0, 1, 1], [], []>} : vector<128x128xbf16>, vector<128x128xbf16>, vector<128x128xf32> -> vector<128x128xf32>
    %3 = arith.truncf %2 : vector<128x128xf32> to vector<128x128xbf16>
    %c0_3 = arith.constant 0 : index
    %c0_4 = arith.constant 0 : index
    %4 = vector.load %arg4[%c0_3, %c0_4] : memref<128x128xbf16, #tpu.memory_space<vmem>>, vector<128x128xbf16>
    tpu.vector_store %arg4[%c0_3, %c0_4], %3 {strides = array<i32>} : memref<128x128xbf16, #tpu.memory_space<vmem>>, vector<128x128xbf16>,
    %c0_5 = arith.constant 0 : index
    %c0_6 = arith.constant 0 : index
    %5 = vector.load %arg1[%c0_5, %c0_6] : memref<128x128xbf16, #tpu.memory_space<vmem>>, vector<128x128xbf16>
    %c0_7 = arith.constant 0 : index
    %c0_8 = arith.constant 0 : index
    %6 = vector.load %arg4[%c0_7, %c0_8] : memref<128x128xbf16, #tpu.memory_space<vmem>>, vector<128x128xbf16>
    %cst_9 = arith.constant dense<0.000000e+00> : vector<128x128xf32>
    %7 = tpu.matmul %5, %6, %cst_9 {dimension_numbers = #tpu.dot_dimension_numbers<[1], [0], [0], [1], [0, 0, 1, 1], [], []>} : vector<128x128xbf16>, vector<128x128xbf16>, vector<128x128xf32> -> vector<128x128xf32>
    %c0_10 = arith.constant 0 : index
    %c0_11 = arith.constant 0 : index
    %8 = vector.load %arg3[%c0_10, %c0_11] : memref<128x128xf32, #tpu.memory_space<vmem>>, vector<128x128xf32>
    tpu.vector_store %arg3[%c0_10, %c0_11], %7 {strides = array<i32>} : memref<128x128xf32, #tpu.memory_space<vmem>>, vector<128x128xf32>,
    return
  }
  func.func @transform_0(%arg0: i32) -> (i32, i32) {
    %c0_i32 = arith.constant 0 : i32
    %c0_i32_0 = arith.constant 0 : i32
    %c0_i32_1 = arith.constant 0 : i32
    return %c0_i32, %c0_i32_0 : i32, i32
  }
  func.func @transform_1(%arg0: i32) -> (i32, i32) {
    %c0_i32 = arith.constant 0 : i32
    %c0_i32_0 = arith.constant 0 : i32
    %c0_i32_1 = arith.constant 0 : i32
    return %c0_i32, %c0_i32_0 : i32, i32
  }
  func.func @transform_2(%arg0: i32) -> (i32, i32) {
    %c0_i32 = arith.constant 0 : i32
    %c0_i32_0 = arith.constant 0 : i32
    %c0_i32_1 = arith.constant 0 : i32
    return %c0_i32, %c0_i32_0 : i32, i32
  }
}

</mosaic_0001>

<bundles_post_ra>
// kernel: tpu_custom_call.1
= control target key start
LH: loop header
LB: loop body
LE: loop exit
PB: predicated region body
PF: predicated region fallthrough
CT: control target
= control target key end

     0   :  { %7 = vsyncpa [#allocation5], 0  ;;  %s766_s0 = inlined_call_operand.hbm [shape: bf16[128,128], index: 0, kind: input, shape index: {}]   ;;  %s767_s1 = inlined_call_operand.hbm [shape: bf16[128,128], index: 1, kind: input, shape index: {}]   ;;  %s768_s2 = inlined_call_operand.hbm [shape: f32[128,128], index: 2, kind: output, shape index: {}]  }
   0x1   :  { %8 = vsyncpa [#allocation8], 0 }
   0x2   :  { %9 = vsyncpa [#allocation6], 0  ;;  %s708_s9 = smov [#allocation4]   ;;  %s636_s13 = scalar_lea.hbm %s766_s0, 1024 }
   0x3   :  { %s15_s10 = sshll.u32 %s708_s9, 4  ;;  %p637_p0 = scmp.ne.s32.totalorder %s766_s0, %s636_s13  ;;  %s16_s10 = int_to_ptr.vmem [resolvable:$true] %s15_s10 }
   0x4   :  { %p640_p1 = scmp.lt.u32.totalorder %s636_s13, %s766_s0 }
   0x6   :  { %p642_p2 = pnand %p640_p1, %p637_p0 }
   0x8   :  { %645 = shalt.err (!%p642_p2)
}
   0x9   :  { %s646_s18 = scalar_lea.vmem %s16_s10, 1024  ;;  %p651_p4 = scmp.lt.s32.totalorder %s16_s10, %s16_s10 }
   0xa   :  { %p647_p3 = scmp.ne.s32.totalorder %s16_s10, %s646_s18  ;;  %p652_p5 = scmp.lt.s32.totalorder %s646_s18, %s646_s18 }
   0xc   :  { %p653_p6 = por %p652_p5, %p651_p4 }
   0xe   :  { %p654_p7 = pnand %p653_p6, %p647_p3 }
  0x10   :  { %657 = shalt.err (!%p654_p7)
}
  0x11   :  { %s709_s19 = smov 64   ;;  %s710_s20 = smov 4  }
  0x12   :  { %21 = dma.hbm_to_vmem [thread:$0]  %s766_s0, 1024, %s16_s10, [#allocation5], %s709_s19, %s709_s19, %s710_s20  }
  0x13   :  { %s711_s23 = smov [#allocation7]   ;;  %s658_s27 = scalar_lea.hbm %s767_s1, 1024 }
  0x14   :  { %s27_s24 = sshll.u32 %s711_s23, 4  ;;  %p659_p8 = scmp.ne.s32.totalorder %s767_s1, %s658_s27  ;;  %s28_s24 = int_to_ptr.vmem [resolvable:$true] %s27_s24 }
  0x15   :  { %p662_p9 = scmp.lt.u32.totalorder %s658_s27, %s767_s1 }
  0x17   :  { %p664_p10 = pnand %p662_p9, %p659_p8 }
  0x19   :  { %667 = shalt.err (!%p664_p10)
}
  0x1a   :  { %s668_s4 = scalar_lea.vmem %s28_s24, 1024  ;;  %p673_p12 = scmp.lt.s32.totalorder %s28_s24, %s28_s24 }
  0x1b   :  { %p669_p11 = scmp.ne.s32.totalorder %s28_s24, %s668_s4  ;;  %p674_p13 = scmp.lt.s32.totalorder %s668_s4, %s668_s4 }
  0x1d   :  { %p675_p0 = por %p674_p13, %p673_p12 }
  0x1f   :  { %p676_p1 = pnand %p675_p0, %p669_p11 }
  0x21   :  { %679 = shalt.err (!%p676_p1)
}
  0x22   :  { %33 = dma.hbm_to_vmem [thread:$0]  %s767_s1, 1024, %s28_s24, [#allocation8], %s709_s19, %s709_s19, %s710_s20  }
  0x23   :  { %702 = dma.done.wait [#allocation5], 1024  }
  0x24   :  { %703 = vsyncadd [#allocation5], 4294966272 }
  0x25   :  { %704 = dma.done.wait [#allocation8], 1024  }
  0x26   :  { %705 = vsyncadd [#allocation8], 4294966272  ;;  %v612_v0 = vld [vmem:[#allocation7] sm:$0xff]   ;;  %v613_v1 = vld [vmem:[#allocation7 + $0x8] sm:$0xff]   ;;  %s712_s1 = smov [#allocation9]  }
  0x27   :  { %541 = vmatprep.subr.bf16.mxu0 %v612_v0  ;;  %v614_v2 = vld [vmem:[#allocation7 + $0x10] sm:$0xff]   ;;  %v615_v3 = vld [vmem:[#allocation7 + $0x18] sm:$0xff]   ;;  %v620_v4 = vld [vmem:[#allocation4] sm:$0xff]   ;;  %s472_s6 = sshll.u32 %s712_s1, 4  ;;  %s473_s6 = int_to_ptr.vmem [resolvable:$true] %s472_s6 }
  0x28   :  { %542 = vmatpush3.bf16.msra.mxu0 %v612_v0  ;;  %557 = vmatprep.mubr.bf16.mxu0 %v620_v4  ;;  %v616_v5 = vld [vmem:[#allocation7 + $0x20] sm:$0xff]   ;;  %v617_v6 = vld [vmem:[#allocation7 + $0x28] sm:$0xff]   ;;  %v618_v7 = vld [vmem:[#allocation7 + $0x30] sm:$0xff]   ;;  %s680_s7 = scalar_lea.vmem %s473_s6, 2048  ;;  %p685_p3 = scmp.lt.s32.totalorder %s473_s6, %s473_s6 }
  0x29   :  { %543 = vmatprep.subr.bf16.mxu0 %v613_v1  ;;  %v619_v8 = vld [vmem:[#allocation7 + $0x38] sm:$0xff]   ;;  %v621_v9 = vld [vmem:[#allocation4 + $0x8] sm:$0xff]   ;;  %v622_v10 = vld [vmem:[#allocation4 + $0x10] sm:$0xff]   ;;  %p681_p2 = scmp.ne.s32.totalorder %s473_s6, %s680_s7  ;;  %p686_p4 = scmp.lt.s32.totalorder %s680_s7, %s680_s7 }
  0x2a   :  { %v623_v11 = vld [vmem:[#allocation4 + $0x18] sm:$0xff]   ;;  %v624_v12 = vld [vmem:[#allocation4 + $0x20] sm:$0xff]   ;;  %v625_v13 = vld [vmem:[#allocation4 + $0x28] sm:$0xff]  }
  0x2b   :  { %v626_v14 = vld [vmem:[#allocation4 + $0x30] sm:$0xff]   ;;  %v627_v15 = vld [vmem:[#allocation4 + $0x38] sm:$0xff]   ;;  %v628_v16 = vld [vmem:[#allocation4] sm:$0xff]   ;;  %p687_p5 = por %p686_p4, %p685_p3 }
  0x2c   :  { %544 = vmatpush3.bf16.msra.mxu0 %v613_v1  ;;  %589 = vmatprep.mubr.bf16.mxu1 %v628_v16  ;;  %v629_v41 = vld [vmem:[#allocation4 + $0x8] sm:$0xff]   ;;  %v630_v42 = vld [vmem:[#allocation4 + $0x10] sm:$0xff]   ;;  %v631_v43 = vld [vmem:[#allocation4 + $0x18] sm:$0xff]  }
  0x2d   :  { %545 = vmatprep.subr.bf16.mxu0 %v614_v2  ;;  %v632_v44 = vld [vmem:[#allocation4 + $0x20] sm:$0xff]   ;;  %v633_v45 = vld [vmem:[#allocation4 + $0x28] sm:$0xff]   ;;  %v634_v46 = vld [vmem:[#allocation4 + $0x30] sm:$0xff]   ;;  %p688_p6 = pnand %p687_p5, %p681_p2 }
  0x2e   :  { %v635_v47 = vld [vmem:[#allocation4 + $0x38] sm:$0xff]  }
  0x30   :  { %546 = vmatpush3.bf16.msra.mxu0 %v614_v2 }
  0x31   :  { %547 = vmatprep.subr.bf16.mxu0 %v615_v3 }
  0x34   :  { %548 = vmatpush3.bf16.msra.mxu0 %v615_v3 }
  0x35   :  { %549 = vmatprep.subr.bf16.mxu0 %v616_v5 }
  0x38   :  { %550 = vmatpush3.bf16.msra.mxu0 %v616_v5 }
  0x39   :  { %551 = vmatprep.subr.bf16.mxu0 %v617_v6 }
  0x3c   :  { %552 = vmatpush3.bf16.msra.mxu0 %v617_v6 }
  0x3d   :  { %553 = vmatprep.subr.bf16.mxu0 %v618_v7 }
  0x40   :  { %554 = vmatpush3.bf16.msra.mxu0 %v618_v7 }
  0x41   :  { %555 = vmatprep.subr.bf16.mxu0 %v619_v8 }
  0x44   :  { %556 = vmatpush3.bf16.msra.mxu0 %v619_v8 }
  0x47   :  { %558 = vmatmul.mubr.bf16.vlgmr.msra.gmra.mrb[0].mxu0 %v621_v9 }
  0x48   :  { %561 = vmatprep.mubr.bf16.mxu0 %v622_v10 }
  0x4f   :  { %562 = vmatmul.mubr.bf16.gmra.mrb[4].mxu0 %v623_v11 }
  0x50   :  { %565 = vmatprep.mubr.bf16.mxu0 %v624_v12 }
  0x57   :  { %566 = vmatmul.mubr.bf16.gmra.mrb[8].mxu0 %v625_v13 }
  0x58   :  { %569 = vmatprep.mubr.bf16.mxu0 %v626_v14 }
  0x5f   :  { %570 = vmatmul.mubr.bf16.gmra.mrb[12].mxu0 %v627_v15 }
 0x11a   :  { %v559_v17 = vpop.f32.mrb[0].mxu0 }
 0x11b   :  { %v203_v18 = vpop.f32.mrb[1].mxu0 }
 0x11c   :  { %v560_v19 = vpop.f32.mrb[2].mxu0 }
 0x11d   :  { %v267_v20 = vpack.c.bf16 %v560_v19, %v559_v17  ;;  %v206_v21 = vpop.f32.mrb[3].mxu0 }
 0x11e   :  { %v266_v22 = vpack.c.bf16 %v206_v21, %v203_v18 }
 0x120   :  { %573 = vmatprep.subr.bf16.mxu1 %v266_v22 }
 0x121   :  { %574 = vmatpush3.bf16.msra.mxu1 %v266_v22 }
 0x122   :  { %v563_v23 = vpop.f32.mrb[4].mxu0  ;;  %575 = vmatprep.subr.bf16.mxu1 %v267_v20 }
 0x123   :  { %v219_v24 = vpop.f32.mrb[5].mxu0 }
 0x124   :  { %v564_v25 = vpop.f32.mrb[6].mxu0 }
 0x125   :  { %v269_v26 = vpack.c.bf16 %v564_v25, %v563_v23  ;;  %v222_v27 = vpop.f32.mrb[7].mxu0  ;;  %576 = vmatpush3.bf16.msra.mxu1 %v267_v20 }
 0x126   :  { %v268_v28 = vpack.c.bf16 %v222_v27, %v219_v24 }
 0x128   :  { %577 = vmatprep.subr.bf16.mxu1 %v268_v28 }
 0x129   :  { %578 = vmatpush3.bf16.msra.mxu1 %v268_v28 }
 0x12a   :  { %v567_v29 = vpop.f32.mrb[8].mxu0  ;;  %579 = vmatprep.subr.bf16.mxu1 %v269_v26 }
 0x12b   :  { %v235_v30 = vpop.f32.mrb[9].mxu0 }
 0x12c   :  { %v568_v31 = vpop.f32.mrb[10].mxu0 }
 0x12d   :  { %v271_v32 = vpack.c.bf16 %v568_v31, %v567_v29  ;;  %v238_v33 = vpop.f32.mrb[11].mxu0  ;;  %580 = vmatpush3.bf16.msra.mxu1 %v269_v26 }
 0x12e   :  { %v270_v34 = vpack.c.bf16 %v238_v33, %v235_v30 }
 0x130   :  { %581 = vmatprep.subr.bf16.mxu1 %v270_v34 }
 0x131   :  { %582 = vmatpush3.bf16.msra.mxu1 %v270_v34 }
 0x132   :  { %v571_v35 = vpop.f32.mrb[12].mxu0  ;;  %583 = vmatprep.subr.bf16.mxu1 %v271_v32 }
 0x133   :  { %v251_v36 = vpop.f32.mrb[13].mxu0 }
 0x134   :  { %v572_v37 = vpop.f32.mrb[14].mxu0 }
 0x135   :  { %v273_v38 = vpack.c.bf16 %v572_v37, %v571_v35  ;;  %v254_v39 = vpop.f32.mrb[15].mxu0  ;;  %584 = vmatpush3.bf16.msra.mxu1 %v271_v32 }
 0x136   :  { %v272_v40 = vpack.c.bf16 %v254_v39, %v251_v36 }
 0x138   :  { %585 = vmatprep.subr.bf16.mxu1 %v272_v40 }
 0x139   :  { %586 = vmatpush3.bf16.msra.mxu1 %v272_v40 }
 0x13a   :  { %587 = vmatprep.subr.bf16.mxu1 %v273_v38 }
 0x13d   :  { %588 = vmatpush3.bf16.msra.mxu1 %v273_v38 }
 0x140   :  { %590 = vmatmul.mubr.bf16.vlgmr.msra.gmra.mrb[0].mxu1 %v629_v41 }
 0x141   :  { %593 = vmatprep.mubr.bf16.mxu1 %v630_v42 }
 0x148   :  { %594 = vmatmul.mubr.bf16.gmra.mrb[4].mxu1 %v631_v43 }
 0x149   :  { %597 = vmatprep.mubr.bf16.mxu1 %v632_v44 }
 0x150   :  { %598 = vmatmul.mubr.bf16.gmra.mrb[8].mxu1 %v633_v45 }
 0x151   :  { %601 = vmatprep.mubr.bf16.mxu1 %v634_v46 }
 0x158   :  { %602 = vmatmul.mubr.bf16.gmra.mrb[12].mxu1 %v635_v47 }
 0x213   :  { %v591_v48 = vpop.f32.mrb[0].mxu1 }
 0x214   :  { %453 = vst [vmem:[#allocation9 + $0x10] sm:$0xff] %v591_v48  ;;  %v388_v49 = vpop.f32.mrb[1].mxu1 }
 0x215   :  { %451 = vst [vmem:[#allocation9] sm:$0xff] %v388_v49  ;;  %v592_v50 = vpop.f32.mrb[2].mxu1 }
 0x216   :  { %454 = vst [vmem:[#allocation9 + $0x18] sm:$0xff] %v592_v50  ;;  %v391_v51 = vpop.f32.mrb[3].mxu1 }
 0x217   :  { %452 = vst [vmem:[#allocation9 + $0x8] sm:$0xff] %v391_v51 }
 0x21b   :  { %v595_v52 = vpop.f32.mrb[4].mxu1 }
 0x21c   :  { %457 = vst [vmem:[#allocation9 + $0x30] sm:$0xff] %v595_v52  ;;  %v404_v53 = vpop.f32.mrb[5].mxu1 }
 0x21d   :  { %455 = vst [vmem:[#allocation9 + $0x20] sm:$0xff] %v404_v53  ;;  %v596_v54 = vpop.f32.mrb[6].mxu1 }
 0x21e   :  { %458 = vst [vmem:[#allocation9 + $0x38] sm:$0xff] %v596_v54  ;;  %v407_v55 = vpop.f32.mrb[7].mxu1 }
 0x21f   :  { %456 = vst [vmem:[#allocation9 + $0x28] sm:$0xff] %v407_v55 }
 0x223   :  { %v599_v56 = vpop.f32.mrb[8].mxu1 }
 0x224   :  { %461 = vst [vmem:[#allocation9 + $0x50] sm:$0xff] %v599_v56  ;;  %v420_v57 = vpop.f32.mrb[9].mxu1 }
 0x225   :  { %459 = vst [vmem:[#allocation9 + $0x40] sm:$0xff] %v420_v57  ;;  %v600_v58 = vpop.f32.mrb[10].mxu1 }
 0x226   :  { %462 = vst [vmem:[#allocation9 + $0x58] sm:$0xff] %v600_v58  ;;  %v423_v59 = vpop.f32.mrb[11].mxu1 }
 0x227   :  { %460 = vst [vmem:[#allocation9 + $0x48] sm:$0xff] %v423_v59 }
 0x22b   :  { %v603_v60 = vpop.f32.mrb[12].mxu1 }
 0x22c   :  { %465 = vst [vmem:[#allocation9 + $0x70] sm:$0xff] %v603_v60  ;;  %v436_v61 = vpop.f32.mrb[13].mxu1 }
 0x22d   :  { %463 = vst [vmem:[#allocation9 + $0x60] sm:$0xff] %v436_v61  ;;  %v604_v62 = vpop.f32.mrb[14].mxu1 }
 0x22e   :  { %466 = vst [vmem:[#allocation9 + $0x78] sm:$0xff] %v604_v62  ;;  %v439_v63 = vpop.f32.mrb[15].mxu1 }
 0x22f   :  { %464 = vst [vmem:[#allocation9 + $0x68] sm:$0xff] %v439_v63 }
 0x230   :  { %691 = shalt.err (!%p688_p6)
}
 0x231   :  { %s692_s10 = scalar_lea.hbm %s768_s2, 2048 }
 0x232   :  { %p693_p7 = scmp.ne.s32.totalorder %s768_s2, %s692_s10  ;;  %p696_p8 = scmp.lt.u32.totalorder %s692_s10, %s768_s2 }
 0x234   :  { %p698_p9 = pnand %p696_p8, %p693_p7 }
 0x236   :  { %701 = shalt.err (!%p698_p9)
}
 0x237   :  { %s713_s15 = smov 128   ;;  %s714_s16 = smov 8  }
 0x238   :  { %478 = dma.vmem_to_hbm [thread:$0]  %s473_s6, 2048, %s768_s2, [#allocation6], %s713_s15, %s713_s15, %s714_s16  }
 0x239   :  { %706 = dma.done.wait [#allocation6], 2048  }
 0x23a   :  { %707 = vsyncadd [#allocation6], 4294965248 }
 0x23b   :  { %482 = vsyncpa [#allocation5], 1 }
 0x23c   :  { %483 = vsyncpa [#allocation8], 1 }
 0x23d   :  { %484 = vsyncpa [#allocation6], 1 }

</bundles_post_ra>
